<compile_context>
chip_gen: v7x
topology: tpu7x:2x2x1
jax: 0.10.0
libtpu: 0.0.40
codegen_flags: <defaults>
</compile_context>

<pallas_src>
import math
from dataclasses import dataclass
from functools import partial
from typing import Optional

import jax
import jax.numpy as jnp
from jax.experimental import pallas as pl
from jax.experimental.pallas import tpu as pltpu


NEG_INF = -1e30          # large-negative instead of -inf (avoids inf-inf NaNs)
_VMEM_LIMIT = 48 * 1024 * 1024   # leaves headroom on v7x (64 MiB / TC)


# --------------------------------------------------------------------------
# Model config (mirrors the PyTorch ModelArgs; small synthetic sizes in main)
# --------------------------------------------------------------------------
@dataclass
class ModelArgs:
    dim: int = 4096
    n_layers: int = 32
    n_heads: int = 32
    n_kv_heads: Optional[int] = None
    vocab_size: int = -1
    multiple_of: int = 256
    ffn_dim_multiplier: Optional[float] = None
    norm_eps: float = 1e-05
    max_batch_size: int = 32
    max_seq_len: int = 2048
    device: str = None


def _pick_tile(dim, candidates):
    """Largest candidate that divides `dim`, else the full dim (full-dim blocks
    are always legal w.r.t. the (8,128) rule)."""
    for c in candidates:
        if c <= dim and dim % c == 0:
            return c
    return dim


# --------------------------------------------------------------------------
# Tiled linear projection (bias-free nn.Linear):  [M,K] @ [K,N] -> [M,N]
# --------------------------------------------------------------------------
def _linear_kernel(x_ref, w_ref, o_ref, acc_ref):
    @pl.when(pl.program_id(2) == 0)
    def _():
        acc_ref[...] = jnp.zeros_like(acc_ref)

    acc_ref[...] += jnp.dot(
        x_ref[...], w_ref[...], preferred_element_type=jnp.float32
    )

    @pl.when(pl.program_id(2) == pl.num_programs(2) - 1)
    def _():
        o_ref[...] = acc_ref[...].astype(o_ref.dtype)


def linear(x, w, out_dtype=None):
    """x: [M, K], w: [K, N] (stored [in, out]) -> [M, N]."""
    if x.dtype != w.dtype:
        x = x.astype(w.dtype)
    out_dtype = out_dtype or w.dtype
    M, K = x.shape
    K2, N = w.shape
    assert K == K2

    # Enlarged tiles: fewer grid steps, less weight re-streaming; 16/32 keep
    # bf16 (16,128) sublane packing full for small-M decode.
    tm = _pick_tile(M, (512, 256, 128, 32, 16, 8))
    tn = _pick_tile(N, (1024, 512, 256, 128))
    tk = _pick_tile(K, (2048, 1024, 512, 256, 128))
    grid = (M // tm, N // tn, K // tk)

    bytes_accessed = (
        M * K * x.dtype.itemsize
        + K * N * w.dtype.itemsize
        + M * N * jnp.dtype(out_dtype).itemsize
    )
    return pl.pallas_call(
        _linear_kernel,
        out_shape=jax.ShapeDtypeStruct((M, N), out_dtype),
        grid=grid,
        in_specs=[
            pl.BlockSpec((tm, tk), lambda i, j, k: (i, k)),
            pl.BlockSpec((tk, tn), lambda i, j, k: (k, j)),
        ],
        out_specs=pl.BlockSpec((tm, tn), lambda i, j, k: (i, j)),
        scratch_shapes=[pltpu.VMEM((tm, tn), jnp.float32)],
        compiler_params=pltpu.CompilerParams(
            dimension_semantics=("parallel", "parallel", "arbitrary"),
            vmem_limit_bytes=_VMEM_LIMIT,
        ),
        cost_estimate=pl.CostEstimate(
            flops=2 * M * N * K, transcendentals=0, bytes_accessed=bytes_accessed
        ),
    )(x, w)


# --------------------------------------------------------------------------
# Flash-style attention, GQA group fusion, q-tiled, KV streamed in tiles.
#   q       : [B, Hkv, M=n_rep*S, hd]   (query heads of one KV group fused,
#                                        already scaled by 1/sqrt(hd) via wq)
#   k/v     : [max_B, Hkv, T_max, hd]   (full KV cache; only [:kv_len] valid)
#   kv_info : SMEM int32[2] = [kv_len, n_valid_kv_tiles]   (runtime scalars)
# No causal mask (faithful to the PyTorch source).
# --------------------------------------------------------------------------
def _flash_attn_kernel(info_ref, q_ref, k_ref, v_ref, o_ref,
                       m_ref, l_ref, acc_ref, *, tkv):
    kt = pl.program_id(3)
    kv_len = info_ref[0]
    n_valid = info_ref[1]

    @pl.when(kt == 0)
    def _():
        m_ref[...] = jnp.full_like(m_ref, NEG_INF)
        l_ref[...] = jnp.zeros_like(l_ref)
        acc_ref[...] = jnp.zeros_like(acc_ref)

    def step(apply_mask):
        q = q_ref[...]                                      # bf16 [tq, hd]
        k = k_ref[...]                                      # bf16 [tkv, hd]
        # contract last dims of both operands: no explicit k.T / XLU transpose
        s = jax.lax.dot_general(
            q, k, (((1,), (1,)), ((), ())), preferred_element_type=jnp.float32
        )                                                   # f32 [tq, tkv]
        if apply_mask:   # only the last *valid* KV tile pays for the iota+select
            pos = kt * tkv + jax.lax.broadcasted_iota(jnp.int32, s.shape, 1)
            s = jnp.where(pos < kv_len, s, NEG_INF)
        m_prev = m_ref[...]
        m_new = jnp.maximum(m_prev, jnp.max(s, axis=-1, keepdims=True))
        alpha = jnp.exp(m_prev - m_new)
        p = jnp.exp(s - m_new)                              # f32 [tq, tkv]
        l_ref[...] = alpha * l_ref[...] + jnp.sum(p, axis=-1, keepdims=True)
        acc_ref[...] = alpha * acc_ref[...] + jnp.dot(
            p.astype(v_ref.dtype), v_ref[...], preferred_element_type=jnp.float32
        )
        m_ref[...] = m_new

    @pl.when(kt < n_valid - 1)        # full (unmasked) tiles
    def _():
        step(False)

    @pl.when(kt == n_valid - 1)       # last valid (possibly partial) tile
    def _():
        step(True)

    # tiles with kt >= n_valid are skipped entirely (index_map clamps them to
    # the previous block index, so they also issue no new DMA).

    @pl.when(kt == pl.num_programs(3) - 1)
    def _():
        inv_l = pl.reciprocal(l_ref[...], approx=True)      # EUP, off the VALU
        o_ref[...] = (acc_ref[...] * inv_l).astype(o_ref.dtype)


def flash_attention(q, k_cache, v_cache, kv_len):
    B, Hkv, M, hd = q.shape
    _, _, T_max, _ = k_cache.shape
    tq = _pick_tile(M, (256, 128, 64, 32, 16, 8))
    tkv = _pick_tile(T_max, (1024, 512, 256, 128, 64, 32, 16, 8))
    n_q_tiles = M // tq
    n_kv_tiles = T_max // tkv          # grid sized from T_max -> no recompile
                                       # when kv_len changes between decode steps

    kv_len = jnp.asarray(kv_len, jnp.int32)
    n_valid = ((kv_len + tkv - 1) // tkv).astype(jnp.int32)
    kv_info = jnp.stack([kv_len, n_valid])                  # int32[2] -> SMEM

    def q_map(b, h, qi, t, info):
        return (b, h, qi, 0)

    def kv_map(b, h, qi, t, info):
        # clamp invalid tiles onto the last valid one: same block index as the
        # previous step -> Pallas elides the DMA; compute is skipped via pl.when
        return (b, h, jnp.minimum(t, info[1] - 1), 0)

    kernel = partial(_flash_attn_kernel, tkv=tkv)
    flops = 4 * B * Hkv * M * T_max * hd
    transc = B * Hkv * M * T_max
    bytes_accessed = 2 * (2 * B * Hkv * M * hd) + 2 * 2 * B * Hkv * T_max * hd

    return pl.pallas_call(
        kernel,
        out_shape=jax.ShapeDtypeStruct((B, Hkv, M, hd), q.dtype),
        grid_spec=pltpu.PrefetchScalarGridSpec(
            num_scalar_prefetch=1,
            grid=(B, Hkv, n_q_tiles, n_kv_tiles),
            in_specs=[
                pl.BlockSpec((None, None, tq, hd), q_map),
                pl.BlockSpec((None, None, tkv, hd), kv_map),
                pl.BlockSpec((None, None, tkv, hd), kv_map),
            ],
            out_specs=pl.BlockSpec((None, None, tq, hd), q_map),
            scratch_shapes=[
                pltpu.VMEM((tq, 1), jnp.float32),    # running max m
                pltpu.VMEM((tq, 1), jnp.float32),    # running denom l
                pltpu.VMEM((tq, hd), jnp.float32),   # output accumulator
            ],
        ),
        compiler_params=pltpu.CompilerParams(
            dimension_semantics=("parallel", "parallel", "parallel", "arbitrary"),
            vmem_limit_bytes=_VMEM_LIMIT,
        ),
        cost_estimate=pl.CostEstimate(
            flops=flops, transcendentals=transc, bytes_accessed=bytes_accessed
        ),
    )(kv_info, q, k_cache, v_cache)
    # TODO(synk): sweep pipeline_mode=pl.Buffered(3) on the K/V specs for
    # long-context prefill if profiling shows exposed KV DMA.


# --------------------------------------------------------------------------
# In-place KV-cache writeback: HBM->HBM DMA of only the S new rows.
#   new      : [B, Hkv, S, hd]          (stays in HBM, pl.ANY)
#   cache    : [max_B, Hkv, T_max, hd]  (HBM, aliased input->output)
#   start_pos: runtime SMEM scalar (no recompile per decode step)
# --------------------------------------------------------------------------
def _kv_update_kernel(new_ref, cache_in_ref, start_ref, cache_out_ref, sem, *,
                      batch, seq):
    del cache_in_ref  # aliased with cache_out_ref; nothing to read
    start = start_ref[0]
    copies = [
        pltpu.make_async_copy(
            new_ref.at[b],
            cache_out_ref.at[b, :, pl.ds(start, seq), :],
            sem.at[b],
        )
        for b in range(batch)
    ]
    for c in copies:
        c.start()
    for c in copies:
        c.wait()


def kv_cache_update(cache, new, start_pos):
    B, Hkv, S, hd = new.shape
    assert new.dtype == cache.dtype
    start_arr = jnp.asarray([start_pos], jnp.int32)
    kernel = partial(_kv_update_kernel, batch=B, seq=S)
    return pl.pallas_call(
        kernel,
        out_shape=jax.ShapeDtypeStruct(cache.shape, cache.dtype),
        in_specs=[
            pl.BlockSpec(memory_space=pl.ANY),                    # new tokens (HBM)
            pl.BlockSpec(memory_space=pl.ANY),                    # cache (alias)
            pl.BlockSpec(memory_space=pltpu.MemorySpace.SMEM),    # start_pos
        ],
        out_specs=pl.BlockSpec(memory_space=pl.ANY),
        scratch_shapes=[pltpu.SemaphoreType.DMA((B,))],
        input_output_aliases={1: 0},
        compiler_params=pltpu.CompilerParams(has_side_effects=True),
    )(new, cache, start_arr)


# --------------------------------------------------------------------------
# Rotary embedding with real cos/sin (no complex64), kept in plain JAX.
# TODO(synk): fuse rotary + the head-major transpose into a Pallas kernel to
#             avoid the extra HBM round trips for long prefill.
# --------------------------------------------------------------------------
def precompute_rotary_cos_sin(head_dim, start_pos, seq_len, theta=10000.0):
    freqs = 1.0 / (
        theta ** (jnp.arange(0, head_dim, 2, dtype=jnp.float32) / head_dim)
    )
    t = jnp.arange(start_pos, start_pos + seq_len, dtype=jnp.float32)
    angles = jnp.outer(t, freqs)                      # [S, hd//2]
    return jnp.cos(angles), jnp.sin(angles)


def apply_rotary_embeddings(x, cos, sin):
    # x: [B, S, H, hd]; cos/sin: [S, hd//2]
    B, S, H, hd = x.shape
    xf = x.astype(jnp.float32).reshape(B, S, H, hd // 2, 2)
    xe, xo = xf[..., 0], xf[..., 1]
    c = cos[None, :, None, :]
    s = sin[None, :, None, :]
    oe = xe * c - xo * s
    oo = xe * s + xo * c
    out = jnp.stack([oe, oo], axis=-1).reshape(B, S, H, hd)
    return out.astype(x.dtype)


# --------------------------------------------------------------------------
# SelfAttention module (deterministic synthetic weights, bf16 params/cache)
# --------------------------------------------------------------------------
class SelfAttentionPallas:
    def __init__(self, args: ModelArgs, key):
        self.n_kv_heads = args.n_heads if args.n_kv_heads is None else args.n_kv_heads
        self.n_heads_q = args.n_heads
        self.n_rep = self.n_heads_q // self.n_kv_heads
        self.head_dim = args.dim // args.n_heads

        dim = args.dim
        q_out = self.n_heads_q * self.head_dim
        kv_out = self.n_kv_heads * self.head_dim
        self.q_out, self.kv_out = q_out, kv_out

        k1, k2, k3, k4 = jax.random.split(key, 4)
        bound = 1.0 / math.sqrt(dim)  # torch nn.Linear default uniform bound
        wq = jax.random.uniform(k1, (dim, q_out), jnp.float32, -bound, bound)
        wk = jax.random.uniform(k2, (dim, kv_out), jnp.float32, -bound, bound)
        wv = jax.random.uniform(k3, (dim, kv_out), jnp.float32, -bound, bound)
        wo = jax.random.uniform(k4, (q_out, dim), jnp.float32, -bound, bound)

        # Unscaled bf16 weights (used by the pure-JAX reference).
        self.wq = wq.astype(jnp.bfloat16)
        self.wk = wk.astype(jnp.bfloat16)
        self.wv = wv.astype(jnp.bfloat16)
        self.wo = wo.astype(jnp.bfloat16)

        # Kernel path: fused QKV weight with 1/sqrt(hd) folded into the q
        # columns (so the attention kernel never rescales q).
        scale = 1.0 / math.sqrt(self.head_dim)
        self.w_qkv = jnp.concatenate([wq * scale, wk, wv], axis=1
                                     ).astype(jnp.bfloat16)

        # KV cache in [max_B, Hkv, T_max, hd] layout so the attention kernel
        # streams it without ever transposing the (large) cache.
        self.cache_k = jnp.zeros(
            (args.max_batch_size, self.n_kv_heads, args.max_seq_len, self.head_dim),
            jnp.bfloat16,
        )
        self.cache_v = jnp.zeros_like(self.cache_k)

    def __call__(self, x, start_pos, cos, sin):
        B, S, D = x.shape
        hd, Hq, Hkv, n_rep = self.head_dim, self.n_heads_q, self.n_kv_heads, self.n_rep
        q_out, kv_out = self.q_out, self.kv_out

        # Fused Q/K/V projection: x is read from HBM once, one wide matmul.
        x2 = x.reshape(B * S, D).astype(jnp.bfloat16)
        qkv = linear(x2, self.w_qkv)                              # [B*S, q+2kv]
        xq = qkv[:, :q_out].reshape(B, S, Hq, hd)                 # pre-scaled
        xk = qkv[:, q_out:q_out + kv_out].reshape(B, S, Hkv, hd)
        xv = qkv[:, q_out + kv_out:].reshape(B, S, Hkv, hd)

        xq = apply_rotary_embeddings(xq, cos, sin)
        xk = apply_rotary_embeddings(xk, cos, sin)

        # Only the *new tokens* are transposed (cheap); the cache never is.
        q = jnp.transpose(xq, (0, 2, 1, 3))          # [B, Hq, S, hd]
        k_new = jnp.transpose(xk, (0, 2, 1, 3))      # [B, Hkv, S, hd]
        v_new = jnp.transpose(xv, (0, 2, 1, 3))      # [B, Hkv, S, hd]

        # In-place (aliased) KV-cache writeback of the S new positions.
        self.cache_k = kv_cache_update(self.cache_k, k_new, start_pos)
        self.cache_v = kv_cache_update(self.cache_v, v_new, start_pos)

        # Fuse the n_rep query heads of each KV group into one q block.
        q_g = q.reshape(B, Hkv, n_rep * S, hd)
        out_g = flash_attention(q_g, self.cache_k, self.cache_v,
                                kv_len=start_pos + S)

        out = out_g.reshape(B, Hq, S, hd)
        out = jnp.transpose(out, (0, 2, 1, 3)).reshape(B * S, Hq * hd)
        return linear(out, self.wo, out_dtype=jnp.float32).reshape(B, S, D)


# --------------------------------------------------------------------------
# Pure-JAX reference (same weights / dtypes / cache semantics, no Pallas)
# --------------------------------------------------------------------------
def reference_forward(mod: SelfAttentionPallas, args: ModelArgs, x, start_pos,
                      cos, sin):
    B, S, D = x.shape
    Hq, Hkv, hd, n_rep = mod.n_heads_q, mod.n_kv_heads, mod.head_dim, mod.n_rep
    T = start_pos + S

    def mm(a, w):
        return jnp.dot(a, w, preferred_element_type=jnp.float32)

    xb = x.reshape(B * S, D).astype(jnp.bfloat16)
    xq = mm(xb, mod.wq).astype(jnp.bfloat16).reshape(B, S, Hq, hd)
    xk = mm(xb, mod.wk).astype(jnp.bfloat16).reshape(B, S, Hkv, hd)
    xv = mm(xb, mod.wv).astype(jnp.bfloat16).reshape(B, S, Hkv, hd)
    xq = apply_rotary_embeddings(xq, cos, sin)
    xk = apply_rotary_embeddings(xk, cos, sin)

    q = jnp.transpose(xq, (0, 2, 1, 3))                       # [B, Hq, S, hd]
    k_new = jnp.transpose(xk, (0, 2, 1, 3))                   # [B, Hkv, S, hd]
    v_new = jnp.transpose(xv, (0, 2, 1, 3))

    ck = jnp.zeros((args.max_batch_size, Hkv, args.max_seq_len, hd), jnp.bfloat16)
    cv = jnp.zeros_like(ck)
    ck = jax.lax.dynamic_update_slice(ck, k_new, (0, 0, start_pos, 0))
    cv = jax.lax.dynamic_update_slice(cv, v_new, (0, 0, start_pos, 0))
    keys = jnp.repeat(ck[:B, :, :T], n_rep, axis=1)           # [B, Hq, T, hd]
    vals = jnp.repeat(cv[:B, :, :T], n_rep, axis=1)

    scores = jnp.einsum("bhsd,bhtd->bhst", q, keys,
                        preferred_element_type=jnp.float32) / math.sqrt(hd)
    p = jax.nn.softmax(scores, axis=-1)                       # f32
    out = jnp.einsum("bhst,bhtd->bhsd", p.astype(jnp.bfloat16), vals,
                     preferred_element_type=jnp.float32).astype(jnp.bfloat16)
    out = jnp.transpose(out, (0, 2, 1, 3)).reshape(B * S, Hq * hd)
    return mm(out, mod.wo).reshape(B, S, D)


# --------------------------------------------------------------------------
if __name__ == "__main__":
    args = ModelArgs(
        dim=32, n_heads=4, n_kv_heads=2, max_batch_size=2, max_seq_len=16
    )
    B, S, start_pos = 2, 8, 4

    key = jax.random.PRNGKey(0)
    kx, kw = jax.random.split(key)
    x = jax.random.normal(kx, (B, S, args.dim), dtype=jnp.float32)

    module = SelfAttentionPallas(args, kw)
    cos, sin = precompute_rotary_cos_sin(args.dim // args.n_heads, start_pos, S)

    out = module(x, start_pos, cos, sin)
    out = jax.block_until_ready(out)

    ref = reference_forward(module, args, x, start_pos, cos, sin)
    ref = jax.block_until_ready(ref)

    assert out.shape == (B, S, args.dim)
    assert jnp.allclose(out, ref, atol=2e-2, rtol=2e-2), "mismatch vs. reference"

    print("KERNEL_OK")
</pallas_src>

<mosaic_0001>
module attributes {stable_mosaic.version = 11 : i64} {
  func.func @_linear_kernel(%arg0: i32, %arg1: i32, %arg2: i32, %arg3: memref<16x32xbf16, #tpu.memory_space<vmem>>, %arg4: memref<32x64xbf16, #tpu.memory_space<vmem>>, %arg5: memref<16x64xbf16, #tpu.memory_space<vmem>>, %arg6: memref<16x64xf32, #tpu.memory_space<vmem>>) attributes {dimension_semantics = [#tpu.dimension_semantics<parallel>, #tpu.dimension_semantics<parallel>, #tpu.dimension_semantics<arbitrary>], iteration_bounds = array<i64: 1, 1, 1>, scalar_prefetch = 0 : i64, scratch_operands = 1 : i64, tpu.core_type = #tpu.core_type<tc>, window_params = [{transform_indices = @transform_0, window_bounds = array<i64: 16, 32>}, {transform_indices = @transform_1, window_bounds = array<i64: 32, 64>}, {transform_indices = @transform_2, window_bounds = array<i64: 16, 64>}]} {
    %c0_i32 = arith.constant 0 : i32
    %0 = arith.cmpi eq, %arg2, %c0_i32 : i32
    %1 = arith.extui %0 : i1 to i32
    %c0_i32_0 = arith.constant 0 : i32
    %2 = arith.cmpi ne, %1, %c0_i32_0 : i32
    scf.if %2 {
      %cst_10 = arith.constant 0.000000e+00 : f32
      %12 = vector.broadcast %cst_10 : f32 to vector<16x64xf32>
      %c0_11 = arith.constant 0 : index
      %c0_12 = arith.constant 0 : index
      %13 = vector.load %arg6[%c0_11, %c0_12] : memref<16x64xf32, #tpu.memory_space<vmem>>, vector<16x64xf32>
      tpu.vector_store %arg6[%c0_11, %c0_12], %12 {strides = array<i32>} : memref<16x64xf32, #tpu.memory_space<vmem>>, vector<16x64xf32>,
    } else {
    }
    %c0 = arith.constant 0 : index
    %c0_1 = arith.constant 0 : index
    %3 = vector.load %arg6[%c0, %c0_1] : memref<16x64xf32, #tpu.memory_space<vmem>>, vector<16x64xf32>
    %c0_2 = arith.constant 0 : index
    %c0_3 = arith.constant 0 : index
    %4 = vector.load %arg3[%c0_2, %c0_3] : memref<16x32xbf16, #tpu.memory_space<vmem>>, vector<16x32xbf16>
    %c0_4 = arith.constant 0 : index
    %c0_5 = arith.constant 0 : index
    %5 = vector.load %arg4[%c0_4, %c0_5] : memref<32x64xbf16, #tpu.memory_space<vmem>>, vector<32x64xbf16>
    %cst = arith.constant dense<0.000000e+00> : vector<16x64xf32>
    %6 = tpu.matmul %4, %5, %cst {dimension_numbers = #tpu.dot_dimension_numbers<[1], [0], [0], [1], [0, 0, 1, 1], [], []>} : vector<16x32xbf16>, vector<32x64xbf16>, vector<16x64xf32> -> vector<16x64xf32>
    %7 = arith.addf %3, %6 : vector<16x64xf32>
    %c0_6 = arith.constant 0 : index
    %c0_7 = arith.constant 0 : index
    %8 = vector.load %arg6[%c0_6, %c0_7] : memref<16x64xf32, #tpu.memory_space<vmem>>, vector<16x64xf32>
    tpu.vector_store %arg6[%c0_6, %c0_7], %7 {strides = array<i32>} : memref<16x64xf32, #tpu.memory_space<vmem>>, vector<16x64xf32>,
    %c0_i32_8 = arith.constant 0 : i32
    %9 = arith.cmpi eq, %arg2, %c0_i32_8 : i32
    %10 = arith.extui %9 : i1 to i32
    %c0_i32_9 = arith.constant 0 : i32
    %11 = arith.cmpi ne, %10, %c0_i32_9 : i32
    scf.if %11 {
      %c0_10 = arith.constant 0 : index
      %c0_11 = arith.constant 0 : index
      %12 = vector.load %arg6[%c0_10, %c0_11] : memref<16x64xf32, #tpu.memory_space<vmem>>, vector<16x64xf32>
      %13 = arith.truncf %12 : vector<16x64xf32> to vector<16x64xbf16>
      %c0_12 = arith.constant 0 : index
      %c0_13 = arith.constant 0 : index
      %14 = vector.load %arg5[%c0_12, %c0_13] : memref<16x64xbf16, #tpu.memory_space<vmem>>, vector<16x64xbf16>
      tpu.vector_store %arg5[%c0_12, %c0_13], %13 {strides = array<i32>} : memref<16x64xbf16, #tpu.memory_space<vmem>>, vector<16x64xbf16>,
    } else {
    }
    return
  }
  func.func @transform_0(%arg0: i32, %arg1: i32, %arg2: i32) -> (i32, i32) {
    %c0_i32 = arith.constant 0 : i32
    return %arg0, %arg2 : i32, i32
  }
  func.func @transform_1(%arg0: i32, %arg1: i32, %arg2: i32) -> (i32, i32) {
    %c0_i32 = arith.constant 0 : i32
    return %arg2, %arg1 : i32, i32
  }
  func.func @transform_2(%arg0: i32, %arg1: i32, %arg2: i32) -> (i32, i32) {
    %c0_i32 = arith.constant 0 : i32
    return %arg0, %arg1 : i32, i32
  }
}

</mosaic_0001>

<bundles_post_ra>
// kernel: tpu_custom_call.1
= control target key start
LH: loop header
LB: loop body
LE: loop exit
PB: predicated region body
PF: predicated region fallthrough
CT: control target
= control target key end

     0   :  { %7 = vsyncpa [#allocation4], 0  ;;  %s329_s0 = inlined_call_operand.hbm [shape: bf16[16,32], index: 0, kind: input, shape index: {}]   ;;  %s330_s1 = inlined_call_operand.hbm [shape: bf16[32,64], index: 1, kind: input, shape index: {}]   ;;  %s331_s2 = inlined_call_operand.hbm [shape: bf16[16,64], index: 2, kind: output, shape index: {}]  }
   0x1   :  { %8 = vsyncpa [#allocation7], 0 }
   0x2   :  { %9 = vsyncpa [#allocation5], 0  ;;  %s258_s9 = smov [#allocation3]   ;;  %s186_s13 = scalar_lea.hbm %s329_s0, 128 }
   0x3   :  { %s15_s10 = sshll.u32 %s258_s9, 4  ;;  %p187_p0 = scmp.ne.s32.totalorder %s329_s0, %s186_s13  ;;  %s16_s10 = int_to_ptr.vmem [resolvable:$true] %s15_s10 }
   0x4   :  { %p190_p1 = scmp.lt.u32.totalorder %s186_s13, %s329_s0 }
   0x6   :  { %p192_p2 = pnand %p190_p1, %p187_p0 }
   0x8   :  { %195 = shalt.err (!%p192_p2)
}
   0x9   :  { %s196_s18 = scalar_lea.vmem %s16_s10, 128  ;;  %p201_p4 = scmp.lt.s32.totalorder %s16_s10, %s16_s10 }
   0xa   :  { %p197_p3 = scmp.ne.s32.totalorder %s16_s10, %s196_s18  ;;  %p202_p5 = scmp.lt.s32.totalorder %s196_s18, %s196_s18 }
   0xc   :  { %p203_p6 = por %p202_p5, %p201_p4 }
   0xe   :  { %p204_p7 = pnand %p203_p6, %p197_p3 }
  0x10   :  { %207 = shalt.err (!%p204_p7)
}
  0x11   :  { %s259_s19 = smov 64   ;;  %s260_s20 = smov 4  }
  0x12   :  { %21 = dma.hbm_to_vmem [thread:$0]  %s329_s0, 128, %s16_s10, [#allocation4], %s259_s19, %s259_s19, %s260_s20  }
  0x13   :  { %s261_s23 = smov [#allocation6]   ;;  %s208_s27 = scalar_lea.hbm %s330_s1, 256 }
  0x14   :  { %s27_s24 = sshll.u32 %s261_s23, 4  ;;  %p209_p8 = scmp.ne.s32.totalorder %s330_s1, %s208_s27  ;;  %s28_s24 = int_to_ptr.vmem [resolvable:$true] %s27_s24 }
  0x15   :  { %p212_p9 = scmp.lt.u32.totalorder %s208_s27, %s330_s1 }
  0x17   :  { %p214_p10 = pnand %p212_p9, %p209_p8 }
  0x19   :  { %217 = shalt.err (!%p214_p10)
}
  0x1a   :  { %s218_s4 = scalar_lea.vmem %s28_s24, 256  ;;  %p223_p12 = scmp.lt.s32.totalorder %s28_s24, %s28_s24 }
  0x1b   :  { %p219_p11 = scmp.ne.s32.totalorder %s28_s24, %s218_s4  ;;  %p224_p13 = scmp.lt.s32.totalorder %s218_s4, %s218_s4 }
  0x1d   :  { %p225_p0 = por %p224_p13, %p223_p12 }
  0x1f   :  { %p226_p1 = pnand %p225_p0, %p219_p11 }
  0x21   :  { %229 = shalt.err (!%p226_p1)
}
  0x22   :  { %33 = dma.hbm_to_vmem [thread:$0]  %s330_s1, 256, %s28_s24, [#allocation7], %s259_s19, %s259_s19, %s260_s20  }
  0x23   :  { %252 = dma.done.wait [#allocation4], 128  }
  0x24   :  { %253 = vsyncadd [#allocation4], 4294967168 }
  0x25   :  { %254 = dma.done.wait [#allocation7], 256  }
  0x26   :  { %255 = vsyncadd [#allocation7], 4294967040  ;;  %vm45_vm0 = vcmask 523264   ;;  %v262_v0 = vmov 0.0   ;;  %vm263_vm1 = vmmov 0   ;;  %v183_v1 = vld [vmem:[#allocation6] sm:$0xff]  }
  0x27   :  { %46 = vst.msk [vmem:[#allocation2] sm:$0xff] %vm45_vm0, %v262_v0  ;;  %47 = vst.msk [vmem:[#allocation2 + $0x8] sm:$0xff] %vm45_vm0, %v262_v0  ;;  %168 = vmatprep.subr.bf16.mxu0 %v262_v0  ;;  %172 = vmatprep.mubr.msk.bf16.mxu0 %vm263_vm1, %v262_v0  ;;  %v184_v2 = vld [vmem:[#allocation6 + $0x8] sm:$0xff]   ;;  %v185_v3 = vld [vmem:[#allocation3] sm:$0xff]   ;;  %vm73_vm2 = vcmask 261120   ;;  %vm136_vm3 = vcmask 519168  }
  0x28   :  { %169 = vmatpush3.bf16.msra.mxu0 %v183_v1  ;;  %s264_s1 = smov [#allocation8]  }
  0x29   :  { %170 = vmatprep.subr.bf16.mxu0 %v262_v0  ;;  %s144_s6 = sshll.u32 %s264_s1, 4  ;;  %s145_s6 = int_to_ptr.vmem [resolvable:$true] %s144_s6 }
  0x2a   :  { %s230_s7 = scalar_lea.vmem %s145_s6, 128  ;;  %p235_p3 = scmp.lt.s32.totalorder %s145_s6, %s145_s6 }
  0x2b   :  { %p231_p2 = scmp.ne.s32.totalorder %s145_s6, %s230_s7  ;;  %p236_p4 = scmp.lt.s32.totalorder %s230_s7, %s230_s7 }
  0x2c   :  { %171 = vmatpush3.bf16.msra.mxu0 %v184_v2 }
  0x2d   :  { %p237_p5 = por %p236_p4, %p235_p3 }
  0x2e   :  { %v48_v4 = vld [vmem:[#allocation2] sm:$0xff]  ;;  %v49_v6 = vld [vmem:[#allocation2 + $0x8] sm:$0xff] }
  0x2f   :  { %173 = vmatmul.mubr.msk.bf16.vlgmr.msra.gmra.mrb[0].mxu0 %vm73_vm2, %v185_v3  ;;  %p238_p6 = pnand %p237_p5, %p231_p2 }
 0x102   :  { %v111_v5 = vpop.f32.mrb[0].mxu0 }
 0x103   :  { %v118_v7 = vadd.f32 %v111_v5, %v48_v4  ;;  %v174_v8 = vpop.f32.mrb[1].mxu0 }
 0x104   :  { %v114_v9 = vpop.f32.mrb[2].mxu0 }
 0x105   :  { %121 = vst.msk [vmem:[#allocation2] sm:$0xff] %vm45_vm0, %v118_v7  ;;  %v119_v10 = vadd.f32 %v114_v9, %v49_v6  ;;  %v175_v11 = vpop.f32.mrb[3].mxu0 }
 0x107   :  { %122 = vst.msk [vmem:[#allocation2 + $0x8] sm:$0xff] %vm45_vm0, %v119_v10 }
 0x10c   :  { %v126_v12 = vld [vmem:[#allocation2] sm:$0xff] }
 0x10d   :  { %v163_v13 = vpack.c.bf16 %v126_v12, %v126_v12 }
 0x10e   :  { %v127_v14 = vld [vmem:[#allocation2 + $0x8] sm:$0xff] }
 0x10f   :  { %v164_v15 = vpack.c.bf16 %v127_v14, %v127_v14  ;;  %137 = vst.msk [vmem:[#allocation8] sm:$0xf] %vm136_vm3, %v163_v13 }
 0x111   :  { %138 = vst.msk [vmem:[#allocation8 + $0x4] sm:$0xf] %vm136_vm3, %v164_v15 }
 0x112   :  { %241 = shalt.err (!%p238_p6)
}
 0x113   :  { %s242_s10 = scalar_lea.hbm %s331_s2, 128 }
 0x114   :  { %p243_p7 = scmp.ne.s32.totalorder %s331_s2, %s242_s10  ;;  %p246_p8 = scmp.lt.u32.totalorder %s242_s10, %s331_s2 }
 0x116   :  { %p248_p9 = pnand %p246_p8, %p243_p7 }
 0x118   :  { %251 = shalt.err (!%p248_p9)
}
 0x119   :  { %150 = dma.vmem_to_hbm [thread:$0]  %s145_s6, 128, %s331_s2, [#allocation5], %s259_s19, %s259_s19, %s260_s20  }
 0x11a   :  { %256 = dma.done.wait [#allocation5], 128  }
 0x11b   :  { %257 = vsyncadd [#allocation5], 4294967168 }
 0x11c   :  { %154 = vsyncpa [#allocation4], 1 }
 0x11d   :  { %155 = vsyncpa [#allocation7], 1 }
 0x11e   :  { %156 = vsyncpa [#allocation5], 1 }

</bundles_post_ra>
